<compile_context>
chip_gen: v5e
topology: v5e:2x2
jax: 0.10.0
libtpu: 0.0.40
codegen_flags: <defaults>
</compile_context>

<pallas_src>
import functools
import math

import jax
import jax.numpy as jnp
from jax.experimental import pallas as pl
from jax.experimental.pallas import tpu as pltpu


def get_positional_encoding(d_model: int, max_len: int = 5000) -> jnp.ndarray:
    """JAX port of the torch helper. Returns (max_len, 1, d_model) float32."""
    position = jnp.arange(0, max_len, dtype=jnp.float32)[:, None]          # (L, 1)
    two_i = jnp.arange(0, d_model, 2, dtype=jnp.float32)                   # (D/2,)
    div_term = jnp.exp(two_i * -(math.log(10000.0) / d_model))             # (D/2,)
    enc = jnp.zeros((max_len, d_model), dtype=jnp.float32)
    enc = enc.at[:, 0::2].set(jnp.sin(position * div_term))
    enc = enc.at[:, 1::2].set(jnp.cos(position * div_term))
    return enc[:, None, :]                                                 # (L, 1, D)


# ---------------------------------------------------------------------------
# Kernels.  Block layout: x/out blocks are (tS, B*D); pe block is (tS, D).
# The batch broadcast of pe is a static loop over B lane-chunks of width D, so
# only static ref slices + elementwise ops are needed (no lane concat/reshape).
# ---------------------------------------------------------------------------

def _pe_add_kernel(x_ref, pe_ref, o_ref):
    d = pe_ref.shape[1]
    n_rep = x_ref.shape[1] // d                      # == batch size B
    pe = pe_ref[...].astype(jnp.float32)             # (tS, D), loaded once
    for b in range(n_rep):
        sl = slice(b * d, (b + 1) * d)               # lane-aligned when D % 128 == 0
        o_ref[:, sl] = (x_ref[:, sl].astype(jnp.float32) + pe).astype(o_ref.dtype)


def _pe_dropout_kernel(seed_ref, x_ref, pe_ref, o_ref, *,
                       keep_thresh_i31, inv_keep_prob, use_hw_prng):
    d = pe_ref.shape[1]
    n_rep = x_ref.shape[1] // d                      # == batch size B
    ts = x_ref.shape[0]
    pe = pe_ref[...].astype(jnp.float32)             # (tS, D)
    inv_keep = jnp.float32(inv_keep_prob)
    thresh = jnp.int32(keep_thresh_i31)

    if use_hw_prng:
        # Re-seed per grid step so every tile draws an independent stream.
        pltpu.prng_seed(seed_ref[0] + pl.program_id(0))

    for b in range(n_rep):
        sl = slice(b * d, (b + 1) * d)
        y = x_ref[:, sl].astype(jnp.float32) + pe    # f32 math, cast at the store

        if use_hw_prng:
            bits = pltpu.prng_random_bits((ts, d))   # stateful stream continues per chunk
            if bits.dtype != jnp.int32:
                bits = pltpu.bitcast(bits, jnp.int32)
        else:
            # Interpret/CPU fallback: counter-based lowbias32 hash keyed on
            # (seed, element index).  TODO(synk): int32 counter wraps for
            # >= 2^31 elements; acceptable for the fallback path only.
            base = (pl.program_id(0) * n_rep + b) * (ts * d)
            lin = (jax.lax.broadcasted_iota(jnp.int32, (ts, d), 0) * d
                   + jax.lax.broadcasted_iota(jnp.int32, (ts, d), 1) + base)
            u = jax.lax.bitcast_convert_type(lin ^ seed_ref[0], jnp.uint32)
            u = u ^ (u >> 16)
            u = u * jnp.uint32(0x7FEB352D)
            u = u ^ (u >> 15)
            u = u * jnp.uint32(0x846CA68B)
            u = u ^ (u >> 16)
            bits = jax.lax.bitcast_convert_type(u, jnp.int32)

        r = jnp.bitwise_and(bits, jnp.int32(0x7FFFFFFF))   # uniform int in [0, 2^31)
        keep = r >= thresh                                  # P(keep) = 1 - p
        o_ref[:, sl] = jnp.where(keep, y * inv_keep,
                                 jnp.float32(0.0)).astype(o_ref.dtype)


# ---------------------------------------------------------------------------
# Wrapper.
# ---------------------------------------------------------------------------

def _pick_tile_s(S, row_bytes, *, target_bytes=4 << 20,
                 min_tile_bytes=512 << 10, want_steps=8):
    """Row tile (sublane dim) for the (S, B*D) layout.

    ~4 MiB x/out tiles amortize per-grid-step overhead (~0.35 us) and reach the
    HBM roofline; double-buffered live set ~ 4.5 tiles ~= 18 MiB, under v7x's
    32 MiB scoped-VMEM default (v5e/v6e have more headroom).  tS is additionally
    capped near S/8 (when tiles stay >= 512 KiB) so v7x's two TensorCores both
    get grid steps and the DMA pipeline has enough stages.
    """
    row_bytes = max(int(row_bytes), 1)
    ts = max(1, min(S, target_bytes // row_bytes))
    cap = pl.cdiv(S, want_steps)
    if cap * row_bytes >= min_tile_bytes:
        ts = min(ts, cap)
    if S >= 8:
        ts = max(8, ts - (ts % 8))     # keep the sublane dim 8-aligned
    else:
        ts = S                         # full extent satisfies the layout rule
    return int(ts)


def positional_encoding_forward(x, pe_buffer, *, dropout_p=0.1, training=True, seed=0):
    """x: (S, B, D); pe_buffer: (max_len, 1, D).  Returns (S, B, D)."""
    S, B, D = x.shape
    itemsize = jnp.dtype(x.dtype).itemsize

    # Registered buffer, sliced + detached; keep it (S, D) so HBM traffic is S*D.
    pe2d = jax.lax.stop_gradient(pe_buffer[:S, 0, :]).astype(x.dtype)      # (S, D)
    x2d = x.reshape(S, B * D)        # free row-major reshape -> lane-dense layout

    tS = _pick_tile_s(S, B * D * itemsize)
    grid = (pl.cdiv(S, tS),)

    # index_maps take (*grid_idx, *prefetch_refs); *_ absorbs the optional seed ref.
    x_spec = pl.BlockSpec((tS, B * D), lambda i, *_: (i, 0))
    pe_spec = pl.BlockSpec((tS, D), lambda i, *_: (i, 0))
    out_spec = pl.BlockSpec((tS, B * D), lambda i, *_: (i, 0))

    cost = pl.CostEstimate(
        flops=3 * S * B * D,
        transcendentals=0,
        bytes_accessed=(2 * S * B * D + S * D) * itemsize,
    )
    cparams = pltpu.CompilerParams(dimension_semantics=("parallel",))
    out_shape = jax.ShapeDtypeStruct((S, B * D), x.dtype)

    apply_dropout = bool(training) and float(dropout_p) > 0.0
    if not apply_dropout:
        grid_spec = pltpu.PrefetchScalarGridSpec(
            num_scalar_prefetch=0, grid=grid,
            in_specs=[x_spec, pe_spec], out_specs=out_spec)
        out2d = pl.pallas_call(
            _pe_add_kernel, out_shape=out_shape, grid_spec=grid_spec,
            compiler_params=cparams, cost_estimate=cost,
            input_output_aliases={0: 0},           # x -> out (in-place if donated)
        )(x2d, pe2d)
        return out2d.reshape(S, B, D)

    # TODO(synk): forward only (no custom_vjp); a backward pass would regenerate
    # the keep mask from (seed, grid step) with the same PRNG.
    p = float(dropout_p)
    keep_thresh = min(max(int(round(p * (1 << 31))), 0), (1 << 31) - 1)
    kernel = functools.partial(
        _pe_dropout_kernel,
        keep_thresh_i31=keep_thresh,
        inv_keep_prob=1.0 / max(1.0 - p, 1e-12),
        use_hw_prng=(jax.default_backend() == "tpu"),
    )
    seed_arr = jnp.asarray([seed], dtype=jnp.int32)
    grid_spec = pltpu.PrefetchScalarGridSpec(
        num_scalar_prefetch=1,                      # seed lands in SMEM
        grid=grid,
        in_specs=[x_spec, pe_spec],
        out_specs=out_spec)
    out2d = pl.pallas_call(
        kernel, out_shape=out_shape, grid_spec=grid_spec,
        compiler_params=cparams, cost_estimate=cost,
        input_output_aliases={1: 0},                # x (arg 1; seed is arg 0) -> out
    )(seed_arr, x2d, pe2d)
    return out2d.reshape(S, B, D)


if __name__ == "__main__":
    # Small shapes consistent with the module: seq=8, batch=2, d_model=32.
    S, B, D = 8, 2, 32
    MAX_LEN = 64

    key = jax.random.PRNGKey(0)
    x = jax.random.normal(key, (S, B, D), dtype=jnp.float32)

    # Deterministic "parameters" (the registered buffer).
    pe_buffer = get_positional_encoding(D, MAX_LEN)          # (MAX_LEN, 1, D)

    # Pure-JAX references, computed up-front.
    ref_eval = x + pe_buffer[:S]
    p = 0.1
    ref_scaled = ref_eval / (1.0 - p)

    # Eval mode (dropout = identity): exact match against the reference.
    out_eval = positional_encoding_forward(x, pe_buffer, dropout_p=p, training=False)
    out_eval = jax.block_until_ready(out_eval)
    assert out_eval.shape == (S, B, D)
    assert jnp.allclose(out_eval, ref_eval, atol=1e-6, rtol=1e-6)

    # Training mode: every output element must be either 0 (dropped) or
    # (x + pe) / (1 - p) (kept and rescaled).
    out_train = positional_encoding_forward(
        x, pe_buffer, dropout_p=p, training=True, seed=0
    )
    out_train = jax.block_until_ready(out_train)
    assert out_train.shape == (S, B, D)
    is_dropped = jnp.isclose(out_train, 0.0, atol=1e-6)
    is_kept = jnp.isclose(out_train, ref_scaled, atol=1e-5, rtol=1e-5)
    assert bool(jnp.all(is_dropped | is_kept))

    print("KERNEL_OK")
</pallas_src>

<mosaic_0001>
module attributes {stable_mosaic.version = 11 : i64} {
  func.func @_pe_add_kernel(%arg0: i32, %arg1: memref<8x64xf32, #tpu.memory_space<vmem>>, %arg2: memref<8x32xf32, #tpu.memory_space<vmem>>, %arg3: memref<8x64xf32, #tpu.memory_space<vmem>>) attributes {dimension_semantics = [#tpu.dimension_semantics<parallel>], iteration_bounds = array<i64: 1>, scalar_prefetch = 0 : i64, scratch_operands = 0 : i64, tpu.core_type = #tpu.core_type<tc>, window_params = [{transform_indices = @transform_0, window_bounds = array<i64: 8, 64>}, {transform_indices = @transform_1, window_bounds = array<i64: 8, 32>}, {transform_indices = @transform_2, window_bounds = array<i64: 8, 64>}]} {
    %c0 = arith.constant 0 : index
    %c0_0 = arith.constant 0 : index
    %0 = vector.load %arg2[%c0, %c0_0] : memref<8x32xf32, #tpu.memory_space<vmem>>, vector<8x32xf32>
    %c0_1 = arith.constant 0 : index
    %c0_2 = arith.constant 0 : index
    %1 = vector.load %arg1[%c0_1, %c0_2] : memref<8x64xf32, #tpu.memory_space<vmem>>, vector<8x32xf32>
    %2 = arith.addf %1, %0 : vector<8x32xf32>
    %c0_3 = arith.constant 0 : index
    %c0_4 = arith.constant 0 : index
    %3 = vector.load %arg3[%c0_3, %c0_4] : memref<8x64xf32, #tpu.memory_space<vmem>>, vector<8x32xf32>
    tpu.vector_store %arg3[%c0_3, %c0_4], %2 {strides = array<i32>} : memref<8x64xf32, #tpu.memory_space<vmem>>, vector<8x32xf32>,
    %c0_5 = arith.constant 0 : index
    %c32 = arith.constant 32 : index
    %4 = vector.load %arg1[%c0_5, %c32] : memref<8x64xf32, #tpu.memory_space<vmem>>, vector<8x32xf32>
    %5 = arith.addf %4, %0 : vector<8x32xf32>
    %c0_6 = arith.constant 0 : index
    %c32_7 = arith.constant 32 : index
    %6 = vector.load %arg3[%c0_6, %c32_7] : memref<8x64xf32, #tpu.memory_space<vmem>>, vector<8x32xf32>
    tpu.vector_store %arg3[%c0_6, %c32_7], %5 {strides = array<i32>} : memref<8x64xf32, #tpu.memory_space<vmem>>, vector<8x32xf32>,
    return
  }
  func.func @transform_0(%arg0: i32) -> (i32, i32) {
    %c0_i32 = arith.constant 0 : i32
    %c0_i32_0 = arith.constant 0 : i32
    return %arg0, %c0_i32 : i32, i32
  }
  func.func @transform_1(%arg0: i32) -> (i32, i32) {
    %c0_i32 = arith.constant 0 : i32
    %c0_i32_0 = arith.constant 0 : i32
    return %arg0, %c0_i32 : i32, i32
  }
  func.func @transform_2(%arg0: i32) -> (i32, i32) {
    %c0_i32 = arith.constant 0 : i32
    %c0_i32_0 = arith.constant 0 : i32
    return %arg0, %c0_i32 : i32, i32
  }
}

</mosaic_0001>

<bundles_post_ra>
// kernel: tpu_custom_call.1
= control target key start
LH: loop header
LB: loop body
LE: loop exit
PB: predicated region body
PF: predicated region fallthrough
CT: control target
= control target key end

     0   :  { %7 = vsyncpa [#allocation3], 0  ;;  %s138_s0 = inlined_call_operand.hbm [shape: f32[8,64], index: 0, kind: input, shape index: {}, may-alias: {0,2}]   ;;  %s139_s1 = inlined_call_operand.vmem [shape: f32[8,32], index: 1, kind: input, shape index: {}]   ;;  %s140_s2 = inlined_call_operand.hbm [shape: f32[8,64], index: 2, kind: output, shape index: {}, may-alias: {0,2}]  }
   0x1   :  { %8 = vsyncpa [#allocation4], 0  ;;  %s14_s11 = sshll.u32 %s138_s0, 4  ;;  %s111_s12 = smov [#allocation2]   ;;  %s15_s11 = int_to_ptr.hbm [resolvable:$true] %s14_s11 }
   0x2   :  { %s16_s13 = sshll.u32 %s111_s12, 4  ;;  %s17_s13 = int_to_ptr.vmem [resolvable:$true] %s16_s13 }
   0x3   :  { %19 = dma.hbm_to_vmem [thread:$0]  %s15_s11, 128, %s17_s13, [#allocation3]  }
   0x4   :  { %107 = dma.done.wait [#allocation3], 128  }
   0x5   :  { %108 = vsyncadd [#allocation3], 4294967168  ;;  %v26_v0 = vld [vmem:[%s139_s1] sm:$0xff]  ;;  %vm29_vm0 = vcmask 261120   ;;  %s112_s16 = smov 32   ;;  %s113_s17 = smov [#allocation5]  }
   0x6   :  { %v27_v1 = vld [vmem:[#allocation2] sm:$0xff]  ;;  %33 = vrot.lane.b32.xlu0 %v26_v0, %s112_s16  ;;  %s44_s18 = sshll.u32 %s113_s17, 4  ;;  %s46_s20 = sshll.u32 %s140_s2, 4  ;;  %vm37_vm1 = vcmask 523520   ;;  %s45_s18 = int_to_ptr.vmem [resolvable:$true] %s44_s18  ;;  %s47_s20 = int_to_ptr.hbm [resolvable:$true] %s46_s20 }
   0x7   :  { %v28_v2 = vadd.f32 %v27_v1, %v26_v0 }
   0x9   :  { %30 = vst.msk [vmem:[#allocation5] sm:$0xff] %vm29_vm0, %v28_v2 }
  0x78   :  { %v34_v3 = vpop.permute.xlu0 %33 }
  0x79   :  { %v36_v4 = vadd.f32 %v34_v3, %v27_v1 }
  0x7b   :  { %38 = vst.msk [vmem:[#allocation5] sm:$0xff] %vm37_vm1, %v36_v4 }
  0x7c   :  { %49 = dma.vmem_to_hbm [thread:$0]  %s45_s18, 128, %s47_s20, [#allocation4]  }
  0x7d   :  { %109 = dma.done.wait [#allocation4], 128  }
  0x7e   :  { %110 = vsyncadd [#allocation4], 4294967168 }
  0x7f   :  { %54 = vsyncpa [#allocation3], 1 }
  0x80   :  { %55 = vsyncpa [#allocation4], 1 }

</bundles_post_ra>
